<compile_context>
chip_gen: v5e
topology: v5e:2x2
jax: 0.10.0
libtpu: 0.0.40
codegen_flags: <defaults>
</compile_context>

<pallas_src>
import jax
import jax.numpy as jnp
from jax.experimental import pallas as pl
from jax.experimental.pallas import tpu as pltpu


def mlp_kernel(x_ref, params_ref, b2_ref, o_ref):
    # x_ref     : (1, N)  f32, batch along lanes (lane-dense)
    # params_ref: (H, 3)  f32, packed [w1 | b1 | w2] columns (n_feature==1,
    #                     n_output==1)
    # b2_ref    : (1,)    f32 in SMEM, second-layer bias scalar
    # o_ref     : (1, N)  f32, lane-dense output
    x = x_ref[...]                                   # (1, N)

    # Static ref-view slices of the packed parameter tile (zero runtime cost).
    w1 = params_ref[:, 0:1]                          # (H, 1)
    b1 = params_ref[:, 1:2]                          # (H, 1)
    w2 = params_ref[:, 2:3]                          # (H, 1)

    # Layer 1: hidden = relu(W1 * x + b1).  K=1 contraction -> pure VPU
    # broadcast (outer product), no MXU.
    h = jnp.maximum(w1 * x + b1, 0.0)                # (H, N)

    # Layer 2: y = W2 . hidden + b2.  Output width 1 -> VPU multiply plus a
    # cross-sublane reduce (XLU slot), no MXU.
    y = jnp.sum(h * w2, axis=0, keepdims=True)       # (1, N)

    o_ref[...] = y + b2_ref[0]


def net_forward(x, w1, b1, w2, b2):
    """Forward pass of Net(n_feature=1, n_hidden=H, n_output=1).

    x : (N, 1)   batch of scalar features (PyTorch layout)
    w1: (1, H)   hidden layer weight, pre-transposed to (in, out)
    b1: (1, H)   hidden layer bias
    w2: (H, 1)   output layer weight, pre-transposed to (in, out)
    b2: (1, 1)   output layer bias
    returns (N, 1)
    """
    n, n_feature = x.shape
    n_hidden = w1.shape[1]
    n_output = w2.shape[1]
    assert n_feature == 1 and n_output == 1, "kernel specialized to Net(1, H, 1)"

    # Batch -> lane axis; no explicit zero pad (full-array block, DMA pads the
    # VMEM tile for free; padded lanes are never stored back).
    x_row = x.reshape(1, n)                                     # (1, N)

    # Pack [w1 | b1 | w2] into one (H, 3) VMEM input.  If weights are reused
    # across calls, hoist this packing out of the per-step path.
    params = jnp.concatenate(
        [w1.reshape(n_hidden, 1), b1.reshape(n_hidden, 1), w2.reshape(n_hidden, 1)],
        axis=1,
    )                                                           # (H, 3)
    b2_s = b2.reshape(1)                                        # (1,) SMEM scalar

    out_row = pl.pallas_call(
        mlp_kernel,
        out_shape=jax.ShapeDtypeStruct((1, n), x.dtype),
        in_specs=[
            pl.BlockSpec(memory_space=pltpu.VMEM),   # x      (1, N)
            pl.BlockSpec(memory_space=pltpu.VMEM),   # params (H, 3)
            pl.BlockSpec(memory_space=pltpu.SMEM),   # b2     (1,)
        ],
        out_specs=pl.BlockSpec(memory_space=pltpu.VMEM),
    )(x_row, params, b2_s)

    # Back to PyTorch layout (N, n_output).
    return out_row.T


if __name__ == "__main__":
    # Shapes implied by the PyTorch script: Net(n_feature=1, n_hidden=10,
    # n_output=1); input x = unsqueeze(linspace(-1, 1, 100), 1) -> (100, 1).
    n_feature, n_hidden, n_output = 1, 10, 1
    N = 100

    x = jnp.linspace(-1.0, 1.0, N, dtype=jnp.float32).reshape(N, 1)

    # Deterministic PyTorch-Linear-style init (uniform +/- 1/sqrt(fan_in)),
    # stored pre-transposed to (in, out).
    key = jax.random.PRNGKey(0)
    k1, k2, k3, k4 = jax.random.split(key, 4)
    bound1 = 1.0 / jnp.sqrt(jnp.float32(n_feature))
    bound2 = 1.0 / jnp.sqrt(jnp.float32(n_hidden))
    w1 = jax.random.uniform(k1, (n_feature, n_hidden), jnp.float32, -bound1, bound1)
    b1 = jax.random.uniform(k2, (1, n_hidden), jnp.float32, -bound1, bound1)
    w2 = jax.random.uniform(k3, (n_hidden, n_output), jnp.float32, -bound2, bound2)
    b2 = jax.random.uniform(k4, (1, n_output), jnp.float32, -bound2, bound2)

    out = net_forward(x, w1, b1, w2, b2)
    jax.block_until_ready(out)

    # Pure-JAX reference of the same forward pass.
    ref = jnp.maximum(x @ w1 + b1, 0.0) @ w2 + b2
    assert out.shape == (N, n_output)
    assert jnp.allclose(out, ref, atol=1e-5, rtol=1e-5)

    print("KERNEL_OK")
</pallas_src>

<mosaic_0001>
module attributes {stable_mosaic.version = 11 : i64} {
  func.func @mlp_kernel(%arg0: memref<1x100xf32, #tpu.memory_space<vmem>>, %arg1: memref<10x3xf32, #tpu.memory_space<vmem>>, %arg2: memref<1xf32, #tpu.memory_space<smem>>, %arg3: memref<1x100xf32, #tpu.memory_space<vmem>>) attributes {dimension_semantics = [], scalar_prefetch = 0 : i64, scratch_operands = 0 : i64, tpu.core_type = #tpu.core_type<tc>} {
    %c0 = arith.constant 0 : index
    %c0_0 = arith.constant 0 : index
    %0 = vector.load %arg0[%c0, %c0_0] : memref<1x100xf32, #tpu.memory_space<vmem>>, vector<1x100xf32>
    %c0_1 = arith.constant 0 : index
    %c0_2 = arith.constant 0 : index
    %1 = vector.load %arg1[%c0_1, %c0_2] : memref<10x3xf32, #tpu.memory_space<vmem>>, vector<10x1xf32>
    %c0_3 = arith.constant 0 : index
    %c1 = arith.constant 1 : index
    %2 = vector.load %arg1[%c0_3, %c1] : memref<10x3xf32, #tpu.memory_space<vmem>>, vector<10x1xf32>
    %c0_4 = arith.constant 0 : index
    %c2 = arith.constant 2 : index
    %3 = vector.load %arg1[%c0_4, %c2] : memref<10x3xf32, #tpu.memory_space<vmem>>, vector<10x1xf32>
    %4 = vector.broadcast %1 : vector<10x1xf32> to vector<10x100xf32>
    %5 = vector.broadcast %0 : vector<1x100xf32> to vector<10x100xf32>
    %6 = arith.mulf %4, %5 : vector<10x100xf32>
    %7 = vector.broadcast %2 : vector<10x1xf32> to vector<10x100xf32>
    %8 = arith.addf %6, %7 : vector<10x100xf32>
    %cst = arith.constant 0.000000e+00 : f32
    %9 = vector.broadcast %cst : f32 to vector<10x100xf32>
    %10 = arith.maximumf %8, %9 : vector<10x100xf32>
    %11 = vector.broadcast %3 : vector<10x1xf32> to vector<10x100xf32>
    %12 = arith.mulf %10, %11 : vector<10x100xf32>
    %cst_5 = arith.constant dense<0.000000e+00> : vector<100xf32>
    %13 = vector.multi_reduction <add>, %12, %cst_5 [0] : vector<10x100xf32> to vector<100xf32>
    %14 = vector.shape_cast %13 : vector<100xf32> to vector<1x100xf32>
    %c0_6 = arith.constant 0 : index
    %15 = memref.load %arg2[%c0_6] : memref<1xf32, #tpu.memory_space<smem>>
    %16 = vector.broadcast %15 : f32 to vector<1x100xf32>
    %17 = arith.addf %14, %16 : vector<1x100xf32>
    %c0_7 = arith.constant 0 : index
    %c0_8 = arith.constant 0 : index
    %18 = vector.load %arg3[%c0_7, %c0_8] : memref<1x100xf32, #tpu.memory_space<vmem>>, vector<1x100xf32>
    tpu.vector_store %arg3[%c0_7, %c0_8], %17 {strides = array<i32>} : memref<1x100xf32, #tpu.memory_space<vmem>>, vector<1x100xf32>,
    return
  }
}

</mosaic_0001>

<bundles_post_ra>
// kernel: tpu_custom_call.1
= control target key start
LH: loop header
LB: loop body
LE: loop exit
PB: predicated region body
PF: predicated region fallthrough
CT: control target
= control target key end

     0   :  { %v123_v1 = vmov 1   ;;  %v124_v2 = vmov 0   ;;  %s162_s0 = inlined_call_operand.vmem [shape: f32[1,100], index: 0, kind: input, shape index: {}]   ;;  %s163_s1 = inlined_call_operand.vmem [shape: f32[10,3], index: 1, kind: input, shape index: {}]   ;;  %s164_s2 = inlined_call_operand.<no memory space> [shape: f32[1], index: 2, kind: input, shape index: {}]   ;;  %s165_s3 = inlined_call_operand.hbm [shape: f32[1,100], index: 3, kind: output, shape index: {}]  }
   0x1   :  { %v17_v0 = vld [vmem:[%s163_s1] sm:$0xff]  ;;  %93 = vset.pattern.permute.xlu1 %v123_v1  ;;  %92 = vset.pattern.permute.xlu0 %v124_v2 }
   0x2   :  { %9 = vsyncpa [#allocation4], 0  ;;  %35 = vperm.xlu1 %93, %v17_v0   ;;  %21 = vperm.xlu0 %92, %v17_v0   ;;  %v125_v3 = vmov 2   ;;  %v18_v4 = vld [vmem:[%s163_s1 + $0x8] sm:$0x3]  ;;  %vm56_vm0 = vcmask 818176   ;;  %v68_v28 = vstv %s164_s2 }
   0x3   :  { %94 = vset.pattern.permute.xlu2 %v125_v3  ;;  %v96_v5 = vld [vmem:[%s162_s0] ss:$0 sm:$0xff]  ;;  %vm58_vm1 = vcmask 812032   ;;  %s126_s18 = smov [#allocation3]   ;;  %s79_s22 = sshll.u32 %s165_s3, 4  ;;  %vm70_vm2 = vcmask 811008   ;;  %s80_s22 = int_to_ptr.hbm [resolvable:$true] %s79_s22 }
   0x4   :  { %47 = vperm.xlu2 %94, %v17_v0   ;;  %s77_s19 = sshll.u32 %s126_s18, 4  ;;  %s78_s19 = int_to_ptr.vmem [resolvable:$true] %s77_s19 }
   0xa   :  { %39 = vperm.xlu1 %93, %v18_v4   ;;  %26 = vperm.xlu0 %92, %v18_v4  }
   0xc   :  { %51 = vperm.xlu2 %94, %v18_v4  }
  0x12   :  { %95 = vset.pattern.permute.xlu0 %v125_v3 }
  0x5e   :  { %v48_v9 = vpop.permute.xlu2 %47 }
  0x66   :  { %v52_v18 = vpop.permute.xlu2 %51 }
  0x74   :  { %v36_v6 = vpop.permute.xlu1 %35  ;;  %v22_v7 = vpop.permute.xlu0 %21 }
  0x75   :  { %v32_v8 = vmul.f32 %v96_v5, %v22_v7 }
  0x77   :  { %v42_v10 = vadd.f32 %v36_v6, %v32_v8 }
  0x79   :  { %v44_v12 = vmax.f32 %v42_v10, 0.0 }
  0x7b   :  { %v54_v16 = vmul.f32 %v48_v9, %v44_v12 }
  0x7c   :  { %v27_v11 = vpop.permute.xlu0 %26  ;;  %v40_v14 = vpop.permute.xlu1 %39 }
  0x7d   :  { %v33_v13 = vmul.f32 %v96_v5, %v27_v11  ;;  %v57_v20 = vsel %vm56_vm0, %v54_v16, 0.0 }
  0x7f   :  { %v43_v15 = vadd.f32 %v40_v14, %v33_v13 }
  0x81   :  { %v45_v17 = vmax.f32 %v43_v15, 0.0 }
  0x83   :  { %v55_v19 = vmul.f32 %v52_v18, %v45_v17 }
  0x85   :  { %v59_v21 = vsel %vm58_vm1, %v55_v19, 0.0 }
  0x86   :  { %v60_v22 = vadd.f32 %v59_v21, %v57_v20 }
  0x88   :  { %v61_v23 = vrot.slane %v60_v22, 4 }
  0x8a   :  { %v62_v24 = vadd.f32 %v61_v23, %v60_v22 }
  0x8c   :  { %v63_v25 = vrot.slane %v62_v24, 2 }
  0x8e   :  { %v64_v26 = vadd.f32 %v63_v25, %v62_v24 }
  0x90   :  { %v65_v27 = vrot.slane %v64_v26, 1 }
  0x92   :  { %v66_v29 = vadd.f32 %v65_v27, %v64_v26 }
  0x94   :  { %v69_v30 = vadd.f32 %v68_v28, %v66_v29 }
  0x96   :  { %71 = vst.msk [vmem:[#allocation3] sm:$0x1] %vm70_vm2, %v69_v30 }
  0x97   :  { %82 = dma.vmem_to_hbm [thread:$0]  %s78_s19, 16, %s80_s22, [#allocation4]  }
  0x98   :  { %121 = dma.done.wait [#allocation4], 16  }
  0x99   :  { %122 = vsyncadd [#allocation4], 4294967280 }
  0x9a   :  { %87 = vsyncpa [#allocation4], 1 }

</bundles_post_ra>
